<compile_context>
chip_gen: v5e
topology: v5e:2x2
jax: 0.10.0
libtpu: 0.0.40
codegen_flags: <defaults>
</compile_context>

<pallas_src>
import jax
import jax.numpy as jnp
from jax.experimental import pallas as pl
from jax.experimental.pallas import tpu as pltpu

_LANE = 128                                   # TPU lane width (last-dim tile)
_SMALL_BYTES = 1 << 20                        # < 1 MiB: skip the kernel entirely
_VMEM_LIMIT_BYTES = 32 * 1024 * 1024          # scoped VMEM limit we request
_VMEM_BLOCK_BUDGET = _VMEM_LIMIT_BYTES // 2   # 2 operands x 2 buffers x block
_MAX_ROW_TILE = 8192                          # 8192 * 128 * 4B = 4 MiB f32 block
                                              # (v5e would be fine with 2048, but
                                              #  a larger cap does not regress it)


# ----------------------------------------------------------------------------
# Kernel 1: lane-dense, tiled, double-buffered VMEM copy (size % 128 == 0).
# ----------------------------------------------------------------------------
def _copy_kernel(x_ref, o_ref):
    # Base-class forward() is `pass`: no transformation of the state.
    o_ref[...] = x_ref[...]


def _row_tile(rows: int, itemsize: int) -> int:
    """Largest multiple-of-8 row tile such that
       2 operands x 2 pipeline buffers x (tb * 128 * itemsize) <= budget,
    capped at _MAX_ROW_TILE, and at ceil(rows/2) so the grid has >= 2 steps
    (pipelined read/write overlap; 2-TC row sharding on v7x)."""
    budget_rows = _VMEM_BLOCK_BUDGET // (4 * _LANE * itemsize)
    half = (rows + 1) // 2
    tb = min(budget_rows, _MAX_ROW_TILE, half)
    tb = max(8, ((tb + 7) // 8) * 8)
    return tb


def _tiled_identity(x: jax.Array) -> jax.Array:
    n = x.size
    rows = n // _LANE
    itemsize = jnp.dtype(x.dtype).itemsize
    x2 = x.reshape(rows, _LANE)               # contiguous reshape: free bitcast
    tb = _row_tile(rows, itemsize)
    grid = (pl.cdiv(rows, tb),)

    out2 = pl.pallas_call(
        _copy_kernel,
        out_shape=jax.ShapeDtypeStruct((rows, _LANE), x.dtype),
        grid=grid,
        in_specs=[pl.BlockSpec((tb, _LANE), lambda i: (i, 0))],
        out_specs=pl.BlockSpec((tb, _LANE), lambda i: (i, 0)),
        compiler_params=pltpu.CompilerParams(
            dimension_semantics=("parallel",),
            vmem_limit_bytes=_VMEM_LIMIT_BYTES,
        ),
        cost_estimate=pl.CostEstimate(
            flops=0,
            transcendentals=0,
            bytes_accessed=2 * rows * _LANE * itemsize,
        ),
    )(x2)
    return out2.reshape(x.shape)


# ----------------------------------------------------------------------------
# Kernel 2: single HBM -> HBM DMA (any shape; no padding, no VMEM bounce).
# ----------------------------------------------------------------------------
def _dma_copy_kernel(x_hbm_ref, o_hbm_ref, sem):
    cp = pltpu.make_async_copy(x_hbm_ref, o_hbm_ref, sem)
    cp.start()
    cp.wait()


def _dma_identity(x: jax.Array) -> jax.Array:
    itemsize = jnp.dtype(x.dtype).itemsize
    return pl.pallas_call(
        _dma_copy_kernel,
        out_shape=jax.ShapeDtypeStruct(x.shape, x.dtype),
        in_specs=[pl.BlockSpec(memory_space=pl.ANY)],
        out_specs=pl.BlockSpec(memory_space=pl.ANY),
        scratch_shapes=[pltpu.SemaphoreType.DMA],
        cost_estimate=pl.CostEstimate(
            flops=0,
            transcendentals=0,
            bytes_accessed=2 * x.size * itemsize,
        ),
    )(x)


# ----------------------------------------------------------------------------
# Dispatcher
# ----------------------------------------------------------------------------
def _identity_pallas(x: jax.Array) -> jax.Array:
    """Bit-exact identity on the state (the base forward() is a no-op)."""
    nbytes = x.size * jnp.dtype(x.dtype).itemsize
    if x.size == 0 or nbytes < _SMALL_BYTES:
        # Tiny / empty (the real ValueNetworkBase case): kernel launch and
        # reshape plumbing is pure fixed overhead — forward is a no-op.
        return x
    if x.size % _LANE == 0:
        # Lane-aligned bulk: lane-dense (rows, 128) tiled copy with big
        # blocks, unmasked stores, software-pipelined across >= 2 grid steps.
        return _tiled_identity(x)
    # Arbitrary / unaligned shape: one HBM->HBM DMA — no pad, no trailing
    # slice, no HBM->VMEM->vreg->VMEM->HBM bounce.
    return _dma_identity(x)


# ----------------------------------------------------------------------------
# Module port
# ----------------------------------------------------------------------------
class _BoxSpace:
    """Minimal stand-in for gym.spaces.Box — only .shape is used."""

    def __init__(self, shape):
        self.shape = tuple(shape)


class ValueNetworkBase:
    """Base network class for value function approximation (Pallas port)."""

    def __init__(self, state_space, activation, num_plant):
        self._state_space = state_space
        self._state_shape = state_space.shape
        if len(self._state_shape) == 1:
            self._state_dim = self._state_shape[0] * num_plant
        else:
            # Multi-dim (image) state spaces left unhandled, as in the source.
            pass
        self.activation = activation
        # The base class defines no parameters.

    def forward(self, x=None):
        # PyTorch base forward() is `pass` (abstract hook).  The faithful
        # compute is a no-op on the state, kept as a bit-exact identity.
        # TODO(synk): subclasses (ValueNetwork / QNetwork) add the MLP layers;
        # the base class itself has no compute beyond this pass-through.
        if x is None:
            return None
        return _identity_pallas(x)

    __call__ = forward


if __name__ == "__main__":
    # Deterministic synthetic setup consistent with an inverted-pendulum
    # observation: state_space.shape = (4,), num_plant = 2 -> state_dim = 8.
    state_space = _BoxSpace((4,))
    num_plant = 2
    net = ValueNetworkBase(state_space, activation=jax.nn.relu, num_plant=num_plant)
    assert net._state_dim == 8

    key = jax.random.PRNGKey(0)
    k1, k2, k3 = jax.random.split(key, 3)

    # 1) Real-world tiny case (batch=2, state_dim=8): early-exit path.
    x_small = jax.random.normal(k1, (2, net._state_dim), dtype=jnp.float32)
    out_small = jax.block_until_ready(net(x_small))
    assert out_small.shape == x_small.shape and out_small.dtype == x_small.dtype
    assert bool(jnp.all(out_small == x_small))

    # 2) Large batched state through the module: lane-aligned -> tiled kernel
    #    (32768 x 8 f32 = 1 MiB; rows = 2048, tb = 1024, grid = 2 steps).
    x_batch = jax.random.normal(k2, (32768, net._state_dim), dtype=jnp.float32)
    out_batch = jax.block_until_ready(net(x_batch))
    assert out_batch.shape == x_batch.shape
    assert bool(jnp.all(out_batch == x_batch))

    # 3) Tiled path with a partial (masked) last block:
    #    rows = 20000, tb = 8192 -> grid = 3 steps, last block 3616 rows.
    x_big = jax.random.normal(k3, (20000, _LANE), dtype=jnp.float32)
    out_big = jax.block_until_ready(_identity_pallas(x_big))
    assert bool(jnp.all(out_big == x_big))

    # 4) Non-lane-aligned large input -> single HBM->HBM DMA path.
    x_odd = jax.random.normal(k1, (1000, 321), dtype=jnp.float32)
    out_odd = jax.block_until_ready(_identity_pallas(x_odd))
    assert out_odd.shape == x_odd.shape and out_odd.dtype == x_odd.dtype
    assert bool(jnp.all(out_odd == x_odd))

    print("KERNEL_OK")
</pallas_src>

<mosaic_0001>
module attributes {stable_mosaic.version = 11 : i64} {
  func.func @_copy_kernel(%arg0: i32, %arg1: memref<1024x128xf32, #tpu.memory_space<vmem>>, %arg2: memref<1024x128xf32, #tpu.memory_space<vmem>>) attributes {dimension_semantics = [#tpu.dimension_semantics<parallel>], iteration_bounds = array<i64: 2>, scalar_prefetch = 0 : i64, scratch_operands = 0 : i64, tpu.core_type = #tpu.core_type<tc>, window_params = [{transform_indices = @transform_0, window_bounds = array<i64: 1024, 128>}, {transform_indices = @transform_1, window_bounds = array<i64: 1024, 128>}]} {
    %c0 = arith.constant 0 : index
    %c0_0 = arith.constant 0 : index
    %0 = vector.load %arg1[%c0, %c0_0] : memref<1024x128xf32, #tpu.memory_space<vmem>>, vector<1024x128xf32>
    %c0_1 = arith.constant 0 : index
    %c0_2 = arith.constant 0 : index
    %1 = vector.load %arg2[%c0_1, %c0_2] : memref<1024x128xf32, #tpu.memory_space<vmem>>, vector<1024x128xf32>
    tpu.vector_store %arg2[%c0_1, %c0_2], %0 {strides = array<i32>} : memref<1024x128xf32, #tpu.memory_space<vmem>>, vector<1024x128xf32>,
    return
  }
  func.func @transform_0(%arg0: i32) -> (i32, i32) {
    %c0_i32 = arith.constant 0 : i32
    %c0_i32_0 = arith.constant 0 : i32
    return %arg0, %c0_i32 : i32, i32
  }
  func.func @transform_1(%arg0: i32) -> (i32, i32) {
    %c0_i32 = arith.constant 0 : i32
    %c0_i32_0 = arith.constant 0 : i32
    return %arg0, %c0_i32 : i32, i32
  }
}

</mosaic_0001>

<bundles_post_ra>
// kernel: tpu_custom_call.1
= control target key start
LH: loop header
LB: loop body
LE: loop exit
PB: predicated region body
PF: predicated region fallthrough
CT: control target
= control target key end

     0   :  { %6 = vsyncpa [#allocation3], 0  ;;  %s1050_s0 = inlined_call_operand.hbm [shape: f32[2048,128], index: 0, kind: input, shape index: {}]   ;;  %s1051_s1 = inlined_call_operand.hbm [shape: f32[2048,128], index: 1, kind: output, shape index: {}]  }
   0x1   :  { %8 = vsyncpa [#allocation3 + $0x1], 0 }
   0x2   :  { %9 = vsyncpa [#allocation4], 0 }
   0x3   :  { %11 = vsyncpa [#allocation4 + $0x1], 0  ;;  %s662_s6 = smov 0   ;;  %s664_s7 = smov 0  }
   0x4   :  { %s666_s8 = smov 0   ;;  %s668_s9 = smov 0  }
   0x5 LB: > { %s683_s10 = sadd.s32 4294967295, %s646_s9   ;;  %s484_s11 = sadd.s32 4294967294, %s646_s9   ;;  %s646_s9 = sphi %s668_s9, %s1061_s9   ;;  %s642_s8 = sphi %s666_s8, %s1060_s8   ;;  %s638_s7 = sphi %s664_s7, %s1059_s7   ;;  %s634_s6 = sphi %s662_s6, %s1058_s6  }
   0x6   : > { %s687_s12 = sadd.s32 1, %s646_s9   ;;  %s24_s13 = sadd.s32 1, %s642_s8 }
   0x7   : > { %s21_s14 = ssub.s32 %s646_s9, %s687_s12  ;;  %p31_p0 = scmp.ne.s32.totalorder %s642_s8, %s638_s7 }
   0x8   : > { %p22_p1 = scmp.eq.s32.totalorder %s21_s14, 0  ;;  %p32_p2 = scmp.eq.s32.totalorder %s646_s9, 0 }
   0x9   : > { %p37_p3 = scmp.ne.s32.totalorder %s638_s7, %s634_s6  ;;  %p38_p4 = scmp.eq.s32.totalorder %s683_s10, 0 }
   0xa   : > { %s699_s15 = scalar_select %p22_p1, %s642_s8, %s24_s13  }
   0xb   : > { %p701_p5 = por %p32_p2, %p31_p0  ;;  %p705_p6 = por %p38_p4, %p37_p3 }
   0xc   : > { %p61_p7 = scmp.eq.s32.totalorder %s683_s10, 1  ;;  %p67_p8 = scmp.eq.s32.totalorder %s484_s11, 1 }
   0xd   : > { %p512_p10 = scmp.lt.s32.totalorder %s646_s9, 2  ;;  %s87_s20 = sand.u32 1, %s642_s8  }
   0xe   : > { %p712_p11 = por %p61_p7, %p31_p0  ;;  %p716_p12 = por %p67_p8, %p37_p3 }
   0xf   : > { %s498_s21 = sshll.u32 %s646_s9, 10  ;;  %s487_s22 = sshll.u32 %s87_s20, 10 }
  0x10   : > { %s96_s25 = scalar_lea.hbm %s1050_s0, %s498_s21  ;;  %s91_s27 = scalar_lea.vmem [#allocation2], %s487_s22 }
  0x11   : > { %s97_s26 = sshll.u32 %s96_s25, 4  ;;  %s99_s28 = sshll.u32 %s91_s27, 4  ;;  %s98_s26 = int_to_ptr.hbm [resolvable:$true] %s97_s26  ;;  %s100_s28 = int_to_ptr.vmem [resolvable:$true] %s99_s28 }
  0x12   : > { %p727_p13 = pnand %p512_p10, %p701_p5  ;;  %p490_p0 = scmp.ge.s32.totalorder %s646_s9, 1 }
  0x13   : > { %p107_p1 = scmp.lt.s32.totalorder %s646_s9, 3  ;;  %s88_s30 = scalar_lea.sflag [#allocation3], %s87_s20 }
  0x14   : > { %s550_s2 = sshra.s32 %s98_s26, 4  ;;  %p554_p3 = pneg %p727_p13  ;;  %s551_s2 = int_to_ptr.hbm [resolvable:$true] %s550_s2 }
  0x15   : > { %s552_s3 = scalar_lea.hbm %s551_s2, 1024  ;;  %s557_s11 = scalar_lea.hbm %s1050_s0, 2048 }
  0x16   : > { %p553_p2 = scmp.ne.s32.totalorder %s551_s2, %s552_s3  ;;  %p558_p5 = scmp.lt.s32.totalorder %s551_s2, %s1050_s0 }
  0x17   : > { %p559_p8 = scmp.lt.s32.totalorder %s557_s11, %s552_s3 }
  0x18   : > { %p555_p4 = pnand %p554_p3, %p553_p2 }
  0x19   : > { %p560_p10 = por %p559_p8, %p558_p5 }
  0x1a   : > { %p556_p7 = pneg %p555_p4 }
  0x1c   : > { %p561_p9 = pnand %p560_p10, %p556_p7 }
  0x1e   : > { %564 = shalt.err (!%p561_p9)
}
  0x1f   : > { %s648_s16 = smov 128   ;;  %s649_s20 = smov 8  }
  0x20   : > { %507 = dma.hbm_to_vmem [thread:$0]  (!%p727_p13), %s98_s26, 16384, %s100_s28, %s88_s30, %s648_s16, %s648_s16, %s649_s20  }
  0x21   : > { %p108_p2 = pnand %p490_p0, %p107_p1 }
  0x22   : > { %s748_s21 = sand.u32 (!%p108_p2), 1, %s638_s7  }
  0x23   : > { %111 = sbr.rel (%p108_p2) target bundleno = 173 (0xad), region = 24  ;;  %s491_s22 = sshll.u32 (!%p108_p2), %s748_s21, 10 }
  0x24   : > { %s114_s23 = scalar_lea.sflag (!%p108_p2), [#allocation3], %s748_s21  ;;  %s752_s24 = scalar_lea.vmem (!%p108_p2), [#allocation2], %s491_s22 }
  0x28   : > { %625 = dma.done.wait (%p705_p6), %s114_s23, 16384  }
  0x29   : > { %627 = vsyncadd (%p705_p6), %s114_s23, 4294950912  ;;  %v139_v0 = vld [vmem:[%s752_s24] sm:$0xff]  ;;  %v140_v1 = vld [vmem:[%s752_s24 + $0x8] sm:$0xff]  ;;  %s761_s25 = scalar_lea.vmem [#allocation5], %s491_s22  ;;  %s499_s17 = sshll.u32 %s683_s10, 10 }
  0x2a   : > { %v141_v2 = vld [vmem:[%s752_s24 + $0x10] sm:$0xff]  ;;  %267 = vst [vmem:[%s761_s25] sm:$0xff] %v139_v0  ;;  %v142_v3 = vld [vmem:[%s752_s24 + $0x18] sm:$0xff]  ;;  %v143_v4 = vld [vmem:[%s752_s24 + $0x20] sm:$0xff]  ;;  %s407_s28 = scalar_lea.hbm %s1051_s1, %s499_s17  ;;  %s408_s10 = sshll.u32 %s761_s25, 4  ;;  %s409_s10 = int_to_ptr.vmem [resolvable:$true] %s408_s10 }
  0x2b   : > { %268 = vst [vmem:[%s761_s25 + $0x8] sm:$0xff] %v140_v1  ;;  %v144_v5 = vld [vmem:[%s752_s24 + $0x28] sm:$0xff]  ;;  %v145_v6 = vld [vmem:[%s752_s24 + $0x30] sm:$0xff]  ;;  %v146_v7 = vld [vmem:[%s752_s24 + $0x38] sm:$0xff]  ;;  %s410_s29 = sshll.u32 %s407_s28, 4  ;;  %s396_s30 = scalar_lea.sflag [#allocation4], %s748_s21  ;;  %s411_s29 = int_to_ptr.hbm [resolvable:$true] %s410_s29 }
  0x2c   : > { %269 = vst [vmem:[%s761_s25 + $0x10] sm:$0xff] %v141_v2  ;;  %v147_v8 = vld [vmem:[%s752_s24 + $0x40] sm:$0xff]  ;;  %v148_v9 = vld [vmem:[%s752_s24 + $0x48] sm:$0xff]  ;;  %v149_v10 = vld [vmem:[%s752_s24 + $0x50] sm:$0xff]  ;;  %s594_s2 = sshra.s32 %s411_s29, 4  ;;  %s600_s11 = scalar_lea.hbm %s1051_s1, 2048  ;;  %s595_s2 = int_to_ptr.hbm [resolvable:$true] %s594_s2 }
  0x2d   : > { %270 = vst [vmem:[%s761_s25 + $0x18] sm:$0xff] %v142_v3  ;;  %v150_v11 = vld [vmem:[%s752_s24 + $0x58] sm:$0xff]  ;;  %v151_v12 = vld [vmem:[%s752_s24 + $0x60] sm:$0xff]  ;;  %v152_v13 = vld [vmem:[%s752_s24 + $0x68] sm:$0xff]  ;;  %s596_s3 = scalar_lea.hbm %s595_s2, 1024  ;;  %p601_p0 = scmp.lt.s32.totalorder %s595_s2, %s1051_s1 }
  0x2e   : > { %271 = vst [vmem:[%s761_s25 + $0x20] sm:$0xff] %v143_v4  ;;  %v153_v14 = vld [vmem:[%s752_s24 + $0x70] sm:$0xff]  ;;  %v154_v15 = vld [vmem:[%s752_s24 + $0x78] sm:$0xff]  ;;  %v155_v16 = vld [vmem:[%s752_s24 + $0x80] sm:$0xff]  ;;  %p597_p6 = scmp.ne.s32.totalorder %s595_s2, %s596_s3  ;;  %p602_p1 = scmp.lt.s32.totalorder %s600_s11, %s596_s3 }
  0x2f   : > { %272 = vst [vmem:[%s761_s25 + $0x28] sm:$0xff] %v144_v5  ;;  %v156_v17 = vld [vmem:[%s752_s24 + $0x88] sm:$0xff]  ;;  %v157_v18 = vld [vmem:[%s752_s24 + $0x90] sm:$0xff]  ;;  %v158_v19 = vld [vmem:[%s752_s24 + $0x98] sm:$0xff] }
  0x30   : > { %273 = vst [vmem:[%s761_s25 + $0x30] sm:$0xff] %v145_v6  ;;  %v159_v20 = vld [vmem:[%s752_s24 + $0xa0] sm:$0xff]  ;;  %v160_v21 = vld [vmem:[%s752_s24 + $0xa8] sm:$0xff]  ;;  %v161_v22 = vld [vmem:[%s752_s24 + $0xb0] sm:$0xff]  ;;  %p598_p9 = pnand %p597_p6, %p712_p11  ;;  %p603_p3 = por %p602_p1, %p601_p0 }
  0x31   : > { %274 = vst [vmem:[%s761_s25 + $0x38] sm:$0xff] %v146_v7  ;;  %v162_v23 = vld [vmem:[%s752_s24 + $0xb8] sm:$0xff]  ;;  %v163_v24 = vld [vmem:[%s752_s24 + $0xc0] sm:$0xff]  ;;  %v164_v25 = vld [vmem:[%s752_s24 + $0xc8] sm:$0xff] }
  0x32   : > { %275 = vst [vmem:[%s761_s25 + $0x40] sm:$0xff] %v147_v8  ;;  %v165_v26 = vld [vmem:[%s752_s24 + $0xd0] sm:$0xff]  ;;  %v166_v27 = vld [vmem:[%s752_s24 + $0xd8] sm:$0xff]  ;;  %v167_v28 = vld [vmem:[%s752_s24 + $0xe0] sm:$0xff]  ;;  %p599_p13 = pneg %p598_p9 }
  0x33   : > { %276 = vst [vmem:[%s761_s25 + $0x48] sm:$0xff] %v148_v9  ;;  %v168_v29 = vld [vmem:[%s752_s24 + $0xe8] sm:$0xff]  ;;  %v169_v30 = vld [vmem:[%s752_s24 + $0xf0] sm:$0xff]  ;;  %v170_v31 = vld [vmem:[%s752_s24 + $0xf8] sm:$0xff] }
  0x34   : > { %277 = vst [vmem:[%s761_s25 + $0x50] sm:$0xff] %v149_v10  ;;  %v171_v32 = vld [vmem:[%s752_s24 + $0x100] sm:$0xff]  ;;  %v172_v33 = vld [vmem:[%s752_s24 + $0x108] sm:$0xff]  ;;  %v173_v34 = vld [vmem:[%s752_s24 + $0x110] sm:$0xff]  ;;  %p604_p4 = pnand %p603_p3, %p599_p13 }
  0x35   : > { %278 = vst [vmem:[%s761_s25 + $0x58] sm:$0xff] %v150_v11  ;;  %v174_v35 = vld [vmem:[%s752_s24 + $0x118] sm:$0xff]  ;;  %v175_v36 = vld [vmem:[%s752_s24 + $0x120] sm:$0xff]  ;;  %v176_v37 = vld [vmem:[%s752_s24 + $0x128] sm:$0xff] }
  0x36   : > { %279 = vst [vmem:[%s761_s25 + $0x60] sm:$0xff] %v151_v12  ;;  %v177_v38 = vld [vmem:[%s752_s24 + $0x130] sm:$0xff]  ;;  %v178_v39 = vld [vmem:[%s752_s24 + $0x138] sm:$0xff]  ;;  %v179_v40 = vld [vmem:[%s752_s24 + $0x140] sm:$0xff] }
  0x37   : > { %280 = vst [vmem:[%s761_s25 + $0x68] sm:$0xff] %v152_v13  ;;  %v180_v41 = vld [vmem:[%s752_s24 + $0x148] sm:$0xff]  ;;  %v181_v42 = vld [vmem:[%s752_s24 + $0x150] sm:$0xff]  ;;  %v182_v43 = vld [vmem:[%s752_s24 + $0x158] sm:$0xff] }
  0x38   : > { %281 = vst [vmem:[%s761_s25 + $0x70] sm:$0xff] %v153_v14  ;;  %v183_v44 = vld [vmem:[%s752_s24 + $0x160] sm:$0xff]  ;;  %v184_v45 = vld [vmem:[%s752_s24 + $0x168] sm:$0xff]  ;;  %v185_v46 = vld [vmem:[%s752_s24 + $0x170] sm:$0xff] }
  0x39   : > { %282 = vst [vmem:[%s761_s25 + $0x78] sm:$0xff] %v154_v15  ;;  %v186_v47 = vld [vmem:[%s752_s24 + $0x178] sm:$0xff]  ;;  %v187_v48 = vld [vmem:[%s752_s24 + $0x180] sm:$0xff]  ;;  %v188_v49 = vld [vmem:[%s752_s24 + $0x188] sm:$0xff] }
  0x3a   : > { %283 = vst [vmem:[%s761_s25 + $0x80] sm:$0xff] %v155_v16  ;;  %v189_v50 = vld [vmem:[%s752_s24 + $0x190] sm:$0xff]  ;;  %v190_v51 = vld [vmem:[%s752_s24 + $0x198] sm:$0xff]  ;;  %v191_v52 = vld [vmem:[%s752_s24 + $0x1a0] sm:$0xff] }
  0x3b   : > { %284 = vst [vmem:[%s761_s25 + $0x88] sm:$0xff] %v156_v17  ;;  %v192_v53 = vld [vmem:[%s752_s24 + $0x1a8] sm:$0xff]  ;;  %v193_v54 = vld [vmem:[%s752_s24 + $0x1b0] sm:$0xff]  ;;  %v194_v55 = vld [vmem:[%s752_s24 + $0x1b8] sm:$0xff] }
  0x3c   : > { %285 = vst [vmem:[%s761_s25 + $0x90] sm:$0xff] %v157_v18  ;;  %v195_v56 = vld [vmem:[%s752_s24 + $0x1c0] sm:$0xff]  ;;  %v196_v57 = vld [vmem:[%s752_s24 + $0x1c8] sm:$0xff]  ;;  %v197_v58 = vld [vmem:[%s752_s24 + $0x1d0] sm:$0xff] }
  0x3d   : > { %286 = vst [vmem:[%s761_s25 + $0x98] sm:$0xff] %v158_v19  ;;  %v198_v59 = vld [vmem:[%s752_s24 + $0x1d8] sm:$0xff]  ;;  %v199_v60 = vld [vmem:[%s752_s24 + $0x1e0] sm:$0xff]  ;;  %v200_v61 = vld [vmem:[%s752_s24 + $0x1e8] sm:$0xff] }
  0x3e   : > { %287 = vst [vmem:[%s761_s25 + $0xa0] sm:$0xff] %v159_v20  ;;  %v201_v62 = vld [vmem:[%s752_s24 + $0x1f0] sm:$0xff]  ;;  %v202_v63 = vld [vmem:[%s752_s24 + $0x1f8] sm:$0xff]  ;;  %v203_v0 = vld [vmem:[%s752_s24 + $0x200] sm:$0xff] }
  0x3f   : > { %288 = vst [vmem:[%s761_s25 + $0xa8] sm:$0xff] %v160_v21  ;;  %v204_v1 = vld [vmem:[%s752_s24 + $0x208] sm:$0xff]  ;;  %v205_v2 = vld [vmem:[%s752_s24 + $0x210] sm:$0xff]  ;;  %v206_v3 = vld [vmem:[%s752_s24 + $0x218] sm:$0xff] }
  0x40   : > { %289 = vst [vmem:[%s761_s25 + $0xb0] sm:$0xff] %v161_v22  ;;  %v207_v4 = vld [vmem:[%s752_s24 + $0x220] sm:$0xff]  ;;  %v208_v5 = vld [vmem:[%s752_s24 + $0x228] sm:$0xff]  ;;  %v209_v6 = vld [vmem:[%s752_s24 + $0x230] sm:$0xff] }
  0x41   : > { %290 = vst [vmem:[%s761_s25 + $0xb8] sm:$0xff] %v162_v23  ;;  %v210_v7 = vld [vmem:[%s752_s24 + $0x238] sm:$0xff]  ;;  %v211_v8 = vld [vmem:[%s752_s24 + $0x240] sm:$0xff]  ;;  %v212_v9 = vld [vmem:[%s752_s24 + $0x248] sm:$0xff] }
  0x42   : > { %291 = vst [vmem:[%s761_s25 + $0xc0] sm:$0xff] %v163_v24  ;;  %v213_v10 = vld [vmem:[%s752_s24 + $0x250] sm:$0xff]  ;;  %v214_v11 = vld [vmem:[%s752_s24 + $0x258] sm:$0xff]  ;;  %v215_v12 = vld [vmem:[%s752_s24 + $0x260] sm:$0xff] }
  0x43   : > { %292 = vst [vmem:[%s761_s25 + $0xc8] sm:$0xff] %v164_v25  ;;  %v216_v13 = vld [vmem:[%s752_s24 + $0x268] sm:$0xff]  ;;  %v217_v14 = vld [vmem:[%s752_s24 + $0x270] sm:$0xff]  ;;  %v218_v15 = vld [vmem:[%s752_s24 + $0x278] sm:$0xff] }
  0x44   : > { %293 = vst [vmem:[%s761_s25 + $0xd0] sm:$0xff] %v165_v26  ;;  %v219_v16 = vld [vmem:[%s752_s24 + $0x280] sm:$0xff]  ;;  %v220_v17 = vld [vmem:[%s752_s24 + $0x288] sm:$0xff]  ;;  %v221_v18 = vld [vmem:[%s752_s24 + $0x290] sm:$0xff] }
  0x45   : > { %294 = vst [vmem:[%s761_s25 + $0xd8] sm:$0xff] %v166_v27  ;;  %v222_v19 = vld [vmem:[%s752_s24 + $0x298] sm:$0xff]  ;;  %v223_v20 = vld [vmem:[%s752_s24 + $0x2a0] sm:$0xff]  ;;  %v224_v21 = vld [vmem:[%s752_s24 + $0x2a8] sm:$0xff] }
  0x46   : > { %295 = vst [vmem:[%s761_s25 + $0xe0] sm:$0xff] %v167_v28  ;;  %v225_v22 = vld [vmem:[%s752_s24 + $0x2b0] sm:$0xff]  ;;  %v226_v23 = vld [vmem:[%s752_s24 + $0x2b8] sm:$0xff]  ;;  %v227_v24 = vld [vmem:[%s752_s24 + $0x2c0] sm:$0xff] }
  0x47   : > { %296 = vst [vmem:[%s761_s25 + $0xe8] sm:$0xff] %v168_v29  ;;  %v228_v25 = vld [vmem:[%s752_s24 + $0x2c8] sm:$0xff]  ;;  %v229_v26 = vld [vmem:[%s752_s24 + $0x2d0] sm:$0xff]  ;;  %v230_v27 = vld [vmem:[%s752_s24 + $0x2d8] sm:$0xff] }
  0x48   : > { %297 = vst [vmem:[%s761_s25 + $0xf0] sm:$0xff] %v169_v30  ;;  %v231_v28 = vld [vmem:[%s752_s24 + $0x2e0] sm:$0xff]  ;;  %v232_v29 = vld [vmem:[%s752_s24 + $0x2e8] sm:$0xff]  ;;  %v233_v30 = vld [vmem:[%s752_s24 + $0x2f0] sm:$0xff] }
  0x49   : > { %298 = vst [vmem:[%s761_s25 + $0xf8] sm:$0xff] %v170_v31  ;;  %v234_v31 = vld [vmem:[%s752_s24 + $0x2f8] sm:$0xff] }
  0x4a   : > { %299 = vst [vmem:[%s761_s25 + $0x100] sm:$0xff] %v171_v32  ;;  %v235_v32 = vld [vmem:[%s752_s24 + $0x300] sm:$0xff] }
  0x4b   : > { %300 = vst [vmem:[%s761_s25 + $0x108] sm:$0xff] %v172_v33  ;;  %v236_v33 = vld [vmem:[%s752_s24 + $0x308] sm:$0xff] }
  0x4c   : > { %301 = vst [vmem:[%s761_s25 + $0x110] sm:$0xff] %v173_v34  ;;  %v237_v34 = vld [vmem:[%s752_s24 + $0x310] sm:$0xff] }
  0x4d   : > { %302 = vst [vmem:[%s761_s25 + $0x118] sm:$0xff] %v174_v35  ;;  %v238_v35 = vld [vmem:[%s752_s24 + $0x318] sm:$0xff] }
  0x4e   : > { %303 = vst [vmem:[%s761_s25 + $0x120] sm:$0xff] %v175_v36  ;;  %v239_v36 = vld [vmem:[%s752_s24 + $0x320] sm:$0xff] }
  0x4f   : > { %304 = vst [vmem:[%s761_s25 + $0x128] sm:$0xff] %v176_v37  ;;  %v240_v37 = vld [vmem:[%s752_s24 + $0x328] sm:$0xff] }
  0x50   : > { %305 = vst [vmem:[%s761_s25 + $0x130] sm:$0xff] %v177_v38  ;;  %v241_v38 = vld [vmem:[%s752_s24 + $0x330] sm:$0xff] }
  0x51   : > { %306 = vst [vmem:[%s761_s25 + $0x138] sm:$0xff] %v178_v39  ;;  %v242_v39 = vld [vmem:[%s752_s24 + $0x338] sm:$0xff] }
  0x52   : > { %307 = vst [vmem:[%s761_s25 + $0x140] sm:$0xff] %v179_v40  ;;  %v243_v40 = vld [vmem:[%s752_s24 + $0x340] sm:$0xff] }
  0x53   : > { %308 = vst [vmem:[%s761_s25 + $0x148] sm:$0xff] %v180_v41  ;;  %v244_v41 = vld [vmem:[%s752_s24 + $0x348] sm:$0xff] }
  0x54   : > { %309 = vst [vmem:[%s761_s25 + $0x150] sm:$0xff] %v181_v42  ;;  %v245_v42 = vld [vmem:[%s752_s24 + $0x350] sm:$0xff] }
  0x55   : > { %310 = vst [vmem:[%s761_s25 + $0x158] sm:$0xff] %v182_v43  ;;  %v246_v43 = vld [vmem:[%s752_s24 + $0x358] sm:$0xff] }
  0x56   : > { %311 = vst [vmem:[%s761_s25 + $0x160] sm:$0xff] %v183_v44  ;;  %v247_v44 = vld [vmem:[%s752_s24 + $0x360] sm:$0xff] }
  0x57   : > { %312 = vst [vmem:[%s761_s25 + $0x168] sm:$0xff] %v184_v45  ;;  %v248_v45 = vld [vmem:[%s752_s24 + $0x368] sm:$0xff] }
  0x58   : > { %313 = vst [vmem:[%s761_s25 + $0x170] sm:$0xff] %v185_v46  ;;  %v249_v46 = vld [vmem:[%s752_s24 + $0x370] sm:$0xff] }
  0x59   : > { %314 = vst [vmem:[%s761_s25 + $0x178] sm:$0xff] %v186_v47  ;;  %v250_v47 = vld [vmem:[%s752_s24 + $0x378] sm:$0xff] }
  0x5a   : > { %315 = vst [vmem:[%s761_s25 + $0x180] sm:$0xff] %v187_v48  ;;  %v251_v48 = vld [vmem:[%s752_s24 + $0x380] sm:$0xff] }
  0x5b   : > { %316 = vst [vmem:[%s761_s25 + $0x188] sm:$0xff] %v188_v49  ;;  %v252_v49 = vld [vmem:[%s752_s24 + $0x388] sm:$0xff] }
  0x5c   : > { %317 = vst [vmem:[%s761_s25 + $0x190] sm:$0xff] %v189_v50  ;;  %v253_v50 = vld [vmem:[%s752_s24 + $0x390] sm:$0xff] }
  0x5d   : > { %318 = vst [vmem:[%s761_s25 + $0x198] sm:$0xff] %v190_v51  ;;  %v254_v51 = vld [vmem:[%s752_s24 + $0x398] sm:$0xff] }
  0x5e   : > { %319 = vst [vmem:[%s761_s25 + $0x1a0] sm:$0xff] %v191_v52  ;;  %v255_v52 = vld [vmem:[%s752_s24 + $0x3a0] sm:$0xff] }
  0x5f   : > { %320 = vst [vmem:[%s761_s25 + $0x1a8] sm:$0xff] %v192_v53  ;;  %v256_v53 = vld [vmem:[%s752_s24 + $0x3a8] sm:$0xff] }
  0x60   : > { %321 = vst [vmem:[%s761_s25 + $0x1b0] sm:$0xff] %v193_v54  ;;  %v257_v54 = vld [vmem:[%s752_s24 + $0x3b0] sm:$0xff] }
  0x61   : > { %322 = vst [vmem:[%s761_s25 + $0x1b8] sm:$0xff] %v194_v55  ;;  %v258_v55 = vld [vmem:[%s752_s24 + $0x3b8] sm:$0xff] }
  0x62   : > { %323 = vst [vmem:[%s761_s25 + $0x1c0] sm:$0xff] %v195_v56  ;;  %v259_v56 = vld [vmem:[%s752_s24 + $0x3c0] sm:$0xff] }
  0x63   : > { %324 = vst [vmem:[%s761_s25 + $0x1c8] sm:$0xff] %v196_v57  ;;  %v260_v57 = vld [vmem:[%s752_s24 + $0x3c8] sm:$0xff] }
  0x64   : > { %325 = vst [vmem:[%s761_s25 + $0x1d0] sm:$0xff] %v197_v58  ;;  %v261_v58 = vld [vmem:[%s752_s24 + $0x3d0] sm:$0xff] }
  0x65   : > { %326 = vst [vmem:[%s761_s25 + $0x1d8] sm:$0xff] %v198_v59  ;;  %v262_v59 = vld [vmem:[%s752_s24 + $0x3d8] sm:$0xff] }
  0x66   : > { %327 = vst [vmem:[%s761_s25 + $0x1e0] sm:$0xff] %v199_v60  ;;  %v263_v60 = vld [vmem:[%s752_s24 + $0x3e0] sm:$0xff] }
  0x67   : > { %328 = vst [vmem:[%s761_s25 + $0x1e8] sm:$0xff] %v200_v61  ;;  %v264_v61 = vld [vmem:[%s752_s24 + $0x3e8] sm:$0xff] }
  0x68   : > { %329 = vst [vmem:[%s761_s25 + $0x1f0] sm:$0xff] %v201_v62  ;;  %v265_v62 = vld [vmem:[%s752_s24 + $0x3f0] sm:$0xff] }
  0x69   : > { %330 = vst [vmem:[%s761_s25 + $0x1f8] sm:$0xff] %v202_v63  ;;  %v266_v63 = vld [vmem:[%s752_s24 + $0x3f8] sm:$0xff] }
  0x6a   : > { %331 = vst [vmem:[%s761_s25 + $0x200] sm:$0xff] %v203_v0 }
  0x6b   : > { %332 = vst [vmem:[%s761_s25 + $0x208] sm:$0xff] %v204_v1 }
  0x6c   : > { %333 = vst [vmem:[%s761_s25 + $0x210] sm:$0xff] %v205_v2 }
  0x6d   : > { %334 = vst [vmem:[%s761_s25 + $0x218] sm:$0xff] %v206_v3 }
  0x6e   : > { %335 = vst [vmem:[%s761_s25 + $0x220] sm:$0xff] %v207_v4 }
  0x6f   : > { %336 = vst [vmem:[%s761_s25 + $0x228] sm:$0xff] %v208_v5 }
  0x70   : > { %337 = vst [vmem:[%s761_s25 + $0x230] sm:$0xff] %v209_v6 }
  0x71   : > { %338 = vst [vmem:[%s761_s25 + $0x238] sm:$0xff] %v210_v7 }
  0x72   : > { %339 = vst [vmem:[%s761_s25 + $0x240] sm:$0xff] %v211_v8 }
  0x73   : > { %340 = vst [vmem:[%s761_s25 + $0x248] sm:$0xff] %v212_v9 }
  0x74   : > { %341 = vst [vmem:[%s761_s25 + $0x250] sm:$0xff] %v213_v10 }
  0x75   : > { %342 = vst [vmem:[%s761_s25 + $0x258] sm:$0xff] %v214_v11 }
  0x76   : > { %343 = vst [vmem:[%s761_s25 + $0x260] sm:$0xff] %v215_v12 }
  0x77   : > { %344 = vst [vmem:[%s761_s25 + $0x268] sm:$0xff] %v216_v13 }
  0x78   : > { %345 = vst [vmem:[%s761_s25 + $0x270] sm:$0xff] %v217_v14 }
  0x79   : > { %346 = vst [vmem:[%s761_s25 + $0x278] sm:$0xff] %v218_v15 }
  0x7a   : > { %347 = vst [vmem:[%s761_s25 + $0x280] sm:$0xff] %v219_v16 }
  0x7b   : > { %348 = vst [vmem:[%s761_s25 + $0x288] sm:$0xff] %v220_v17 }
  0x7c   : > { %349 = vst [vmem:[%s761_s25 + $0x290] sm:$0xff] %v221_v18 }
  0x7d   : > { %350 = vst [vmem:[%s761_s25 + $0x298] sm:$0xff] %v222_v19 }
  0x7e   : > { %351 = vst [vmem:[%s761_s25 + $0x2a0] sm:$0xff] %v223_v20 }
  0x7f   : > { %352 = vst [vmem:[%s761_s25 + $0x2a8] sm:$0xff] %v224_v21 }
  0x80   : > { %353 = vst [vmem:[%s761_s25 + $0x2b0] sm:$0xff] %v225_v22 }
  0x81   : > { %354 = vst [vmem:[%s761_s25 + $0x2b8] sm:$0xff] %v226_v23 }
  0x82   : > { %355 = vst [vmem:[%s761_s25 + $0x2c0] sm:$0xff] %v227_v24 }
  0x83   : > { %356 = vst [vmem:[%s761_s25 + $0x2c8] sm:$0xff] %v228_v25 }
  0x84   : > { %357 = vst [vmem:[%s761_s25 + $0x2d0] sm:$0xff] %v229_v26 }
  0x85   : > { %358 = vst [vmem:[%s761_s25 + $0x2d8] sm:$0xff] %v230_v27 }
  0x86   : > { %359 = vst [vmem:[%s761_s25 + $0x2e0] sm:$0xff] %v231_v28 }
  0x87   : > { %360 = vst [vmem:[%s761_s25 + $0x2e8] sm:$0xff] %v232_v29 }
  0x88   : > { %361 = vst [vmem:[%s761_s25 + $0x2f0] sm:$0xff] %v233_v30 }
  0x89   : > { %362 = vst [vmem:[%s761_s25 + $0x2f8] sm:$0xff] %v234_v31 }
  0x8a   : > { %363 = vst [vmem:[%s761_s25 + $0x300] sm:$0xff] %v235_v32 }
  0x8b   : > { %364 = vst [vmem:[%s761_s25 + $0x308] sm:$0xff] %v236_v33 }
  0x8c   : > { %365 = vst [vmem:[%s761_s25 + $0x310] sm:$0xff] %v237_v34 }
  0x8d   : > { %366 = vst [vmem:[%s761_s25 + $0x318] sm:$0xff] %v238_v35 }
  0x8e   : > { %367 = vst [vmem:[%s761_s25 + $0x320] sm:$0xff] %v239_v36 }
  0x8f   : > { %368 = vst [vmem:[%s761_s25 + $0x328] sm:$0xff] %v240_v37 }
  0x90   : > { %369 = vst [vmem:[%s761_s25 + $0x330] sm:$0xff] %v241_v38 }
  0x91   : > { %370 = vst [vmem:[%s761_s25 + $0x338] sm:$0xff] %v242_v39 }
  0x92   : > { %371 = vst [vmem:[%s761_s25 + $0x340] sm:$0xff] %v243_v40 }
  0x93   : > { %372 = vst [vmem:[%s761_s25 + $0x348] sm:$0xff] %v244_v41 }
  0x94   : > { %373 = vst [vmem:[%s761_s25 + $0x350] sm:$0xff] %v245_v42 }
  0x95   : > { %374 = vst [vmem:[%s761_s25 + $0x358] sm:$0xff] %v246_v43 }
  0x96   : > { %375 = vst [vmem:[%s761_s25 + $0x360] sm:$0xff] %v247_v44 }
  0x97   : > { %376 = vst [vmem:[%s761_s25 + $0x368] sm:$0xff] %v248_v45 }
  0x98   : > { %377 = vst [vmem:[%s761_s25 + $0x370] sm:$0xff] %v249_v46 }
  0x99   : > { %378 = vst [vmem:[%s761_s25 + $0x378] sm:$0xff] %v250_v47 }
  0x9a   : > { %379 = vst [vmem:[%s761_s25 + $0x380] sm:$0xff] %v251_v48 }
  0x9b   : > { %380 = vst [vmem:[%s761_s25 + $0x388] sm:$0xff] %v252_v49 }
  0x9c   : > { %381 = vst [vmem:[%s761_s25 + $0x390] sm:$0xff] %v253_v50 }
  0x9d   : > { %382 = vst [vmem:[%s761_s25 + $0x398] sm:$0xff] %v254_v51 }
  0x9e   : > { %383 = vst [vmem:[%s761_s25 + $0x3a0] sm:$0xff] %v255_v52 }
  0x9f   : > { %384 = vst [vmem:[%s761_s25 + $0x3a8] sm:$0xff] %v256_v53 }
  0xa0   : > { %385 = vst [vmem:[%s761_s25 + $0x3b0] sm:$0xff] %v257_v54 }
  0xa1   : > { %386 = vst [vmem:[%s761_s25 + $0x3b8] sm:$0xff] %v258_v55 }
  0xa2   : > { %387 = vst [vmem:[%s761_s25 + $0x3c0] sm:$0xff] %v259_v56 }
  0xa3   : > { %388 = vst [vmem:[%s761_s25 + $0x3c8] sm:$0xff] %v260_v57 }
  0xa4   : > { %389 = vst [vmem:[%s761_s25 + $0x3d0] sm:$0xff] %v261_v58 }
  0xa5   : > { %390 = vst [vmem:[%s761_s25 + $0x3d8] sm:$0xff] %v262_v59 }
  0xa6   : > { %391 = vst [vmem:[%s761_s25 + $0x3e0] sm:$0xff] %v263_v60 }
  0xa7   : > { %392 = vst [vmem:[%s761_s25 + $0x3e8] sm:$0xff] %v264_v61 }
  0xa8   : > { %393 = vst [vmem:[%s761_s25 + $0x3f0] sm:$0xff] %v265_v62 }
  0xa9   : > { %394 = vst [vmem:[%s761_s25 + $0x3f8] sm:$0xff] %v266_v63 }
  0xaa   : > { %607 = shalt.err (!%p604_p4)
}
  0xab   : > { %s650_s16 = smov 128   ;;  %s651_s20 = smov 8  }
  0xac   : > { %502 = dma.vmem_to_hbm [thread:$0]  (%p712_p11), %s409_s10, 16384, %s411_s29, %s396_s30, %s650_s16, %s650_s16, %s651_s20  }
  0xad PF: > { %s425_s21 = sand.u32 1, %s634_s6   ;;  %p1057_p7 = scmp.ge.s32.totalorder %s646_s9, 2 }
  0xae   : > { %s426_s22 = scalar_lea.sflag [#allocation4], %s425_s21 }
  0xaf   : > { %p509_p5 = pnand %p1057_p7, %p716_p12 }
  0xb1   : > { %p510_p8 = pneg %p509_p5 }
  0xb3   : > { %629 = dma.done.wait (%p510_p8), %s426_s22, 16384  }
  0xb4   : > { %631 = vsyncadd (%p510_p8), %s426_s22, 4294950912  ;;  %p14_p10 = scmp.ge.s32.totalorder %s687_s12, 4   ;;  %s1058_s6 = smov %s638_s7 }
  0xb5   : > { %s1059_s7 = smov %s642_s8  ;;  %s1060_s8 = smov %s699_s15 }
  0xb6   : > { %s1061_s9 = smov %s687_s12  ;;  %16 = sbr.rel (!%p14_p10) target bundleno = 5 (0x5), region = 69 }
  0xbb   :  { %432 = vsyncpa [#allocation3], 1 }
  0xbc   :  { %434 = vsyncpa [#allocation3 + $0x1], 1 }
  0xbd   :  { %435 = vsyncpa [#allocation4], 1 }
  0xbe   :  { %437 = vsyncpa [#allocation4 + $0x1], 1 }

</bundles_post_ra>
